<compile_context>
chip_gen: v6e
topology: v6e:2x2x1
jax: 0.10.0
libtpu: 0.0.40
codegen_flags: <defaults>
</compile_context>

<pallas_src>
import jax
import jax.numpy as jnp
from jax.experimental import pallas as pl
from jax.experimental.pallas import tpu as pltpu

LANES = 128          # vreg lane width
SUBLANES = 8         # vreg sublane count
TR = 4096            # rows per grid step (4096x128 f32 = 2 MiB per stream)
PAD_LOGIT = -1.0e4   # exp(-|PAD_LOGIT|) == 0.0 exactly -> padded loss == 0.0


def _make_focal_kernel(gamma, alpha, block_rows, rows_valid, needs_mask):
    gamma = float(gamma)
    gamma_is_two = gamma == 2.0
    sub_blocks = block_rows // SUBLANES

    def _fold(v):
        # Collapse (block_rows, 128) -> (8, 128) with pure VALU adds.
        return jnp.sum(v.reshape(sub_blocks, SUBLANES, LANES), axis=0)

    def kernel(x_ref, t_ref, out_ref):
        i = pl.program_id(0)

        @pl.when(i == 0)
        def _():
            out_ref[...] = jnp.zeros_like(out_ref)

        x = x_ref[...]                       # (block_rows, 128) f32 logits
        t = t_ref[...]
        if t.dtype != jnp.float32:
            t = t.astype(jnp.float32)        # native-dtype stream, cast on VPU

        # Hard {0,1} targets: fold the target into the sign of the logit.
        # s = logit of the *true* class, so pt = sigmoid(s).
        pos = t >= 0.5
        neg_x = -x
        s = jnp.where(pos, x, neg_x)

        # One EUP exp feeds both sigmoid and the stable log1p BCE term
        # (|s| == |x|, so reuse abs(x)).
        e = jnp.exp(-jnp.abs(x))
        d = 1.0 + e
        r = pl.reciprocal(d, approx=True)    # EUP vrcp
        r = r * (2.0 - d * r)                # one Newton step -> ~1e-7 rel err

        # 1 - pt = sigmoid(-s)
        one_minus_pt = jnp.where(s >= 0.0, e * r, r)
        # BCE with logits == softplus(-s) (numerically stable form)
        ce = jnp.maximum(jnp.where(pos, neg_x, x), 0.0) + jnp.log1p(e)

        if gamma_is_two:
            focal = one_minus_pt * one_minus_pt          # VPU mul, no pow
        else:
            focal = jnp.power(one_minus_pt, gamma)
        loss = focal * ce
        if alpha is not None:
            loss = loss * jnp.where(pos, jnp.float32(alpha),
                                    jnp.float32(1.0 - alpha))

        if needs_mask:
            # Only the last grid step can contain Pallas-padded (undefined)
            # rows; mask with a select (robust even if the garbage is NaN/Inf).
            last = pl.num_programs(0) - 1

            @pl.when(i != last)
            def _():
                out_ref[...] += _fold(loss)

            @pl.when(i == last)
            def _():
                rid = jax.lax.broadcasted_iota(
                    jnp.int32, (block_rows, LANES), 0) + i * block_rows
                out_ref[...] += _fold(jnp.where(rid < rows_valid, loss, 0.0))
        else:
            out_ref[...] += _fold(loss)

    return kernel


def binary_focal_loss(inputs, targets, *, gamma: float = 2.0, alpha=None,
                      reduction: str = "mean"):
    """inputs, targets: [B,C,H,W] arrays (targets one-hot / {0,1})."""
    assert inputs.shape == targets.shape
    n_valid = inputs.size
    if n_valid == 0:
        return jnp.float32(0.0)

    # Flat views are free (contiguous bitcast); logits kept / made f32,
    # targets streamed in their native dtype (cast happens in-kernel).
    x = inputs.reshape(-1)
    if x.dtype != jnp.float32:
        x = x.astype(jnp.float32)
    t = targets.reshape(-1)

    # Fallback pad only when numel is not (8*128)-aligned.  Padded elements
    # (logit=-1e4, target=0) contribute exactly zero loss.  For typical NCHW
    # sizes this branch is skipped, so no extra HBM pass is added.
    chunk = SUBLANES * LANES
    n_pad = (-n_valid) % chunk
    if n_pad:
        x = jnp.pad(x, (0, n_pad), constant_values=PAD_LOGIT)
        t = jnp.pad(t, (0, n_pad), constant_values=0)

    rows = (n_valid + n_pad) // LANES        # multiple of 8
    x = x.reshape(rows, LANES)
    t = t.reshape(rows, LANES)

    block_rows = min(TR, rows)               # multiple of 8, <= array extent
    nblocks = -(-rows // block_rows)
    needs_mask = (rows % block_rows) != 0    # ragged last block handled in-kernel

    kernel = _make_focal_kernel(gamma, alpha, block_rows, rows, needs_mask)

    partials = pl.pallas_call(
        kernel,
        out_shape=jax.ShapeDtypeStruct((SUBLANES, LANES), jnp.float32),
        grid_spec=pltpu.PrefetchScalarGridSpec(
            num_scalar_prefetch=0,
            grid=(nblocks,),
            in_specs=[
                pl.BlockSpec((block_rows, LANES), lambda i: (i, 0)),
                pl.BlockSpec((block_rows, LANES), lambda i: (i, 0)),
            ],
            # Lane-dense (8,128) output block doubles as the accumulator;
            # it stays VMEM-resident across the whole reduction axis.
            out_specs=pl.BlockSpec((SUBLANES, LANES), lambda i: (0, 0)),
        ),
        compiler_params=pltpu.CompilerParams(
            dimension_semantics=("arbitrary",),
            vmem_limit_bytes=32 * 1024 * 1024,
        ),
    )(x, t)

    total = jnp.sum(partials)

    if reduction == "mean":
        return total / jnp.float32(n_valid)
    elif reduction == "sum":
        return total
    else:
        raise ValueError(f"unsupported reduction: {reduction}")


def _reference(inputs, targets, gamma=2.0, alpha=None):
    x = inputs.astype(jnp.float32)
    t = targets.astype(jnp.float32)
    p = jax.nn.sigmoid(x)
    ce = jnp.maximum(x, 0.0) - x * t + jnp.log1p(jnp.exp(-jnp.abs(x)))
    pt = p * t + (1.0 - p) * (1.0 - t)
    loss = jnp.power(1.0 - pt, gamma) * ce
    if alpha is not None:
        loss = loss * (alpha * t + (1.0 - alpha) * (1.0 - t))
    return jnp.mean(loss)


if __name__ == "__main__":
    B, C, H, W = 2, 4, 16, 16
    key = jax.random.PRNGKey(0)
    k1, k2 = jax.random.split(key)

    # Logits [B,C,H,W]
    logits = jax.random.normal(k1, (B, C, H, W), dtype=jnp.float32)
    # Integer targets [B,H,W] -> one-hot [B,C,H,W] (mirrors the module's
    # _one_hot_targets path with ignore_index=None).
    tgt_int = jax.random.randint(k2, (B, H, W), 0, C)
    tgt_onehot = jnp.moveaxis(
        jax.nn.one_hot(tgt_int, C, dtype=jnp.float32), -1, 1)

    loss_fn = jax.jit(lambda a, b: binary_focal_loss(
        a, b, gamma=2.0, alpha=None, reduction="mean"))
    loss = jax.block_until_ready(loss_fn(logits, tgt_onehot))

    ref = _reference(logits, tgt_onehot)
    assert jnp.allclose(loss, ref, rtol=1e-5, atol=1e-6), (loss, ref)
    print("KERNEL_OK")
</pallas_src>

<mosaic_0001>
module attributes {stable_mosaic.version = 11 : i64} {
  func.func @kernel(%arg0: i32, %arg1: memref<16x128xf32, #tpu.memory_space<vmem>>, %arg2: memref<16x128xf32, #tpu.memory_space<vmem>>, %arg3: memref<8x128xf32, #tpu.memory_space<vmem>>) attributes {dimension_semantics = [#tpu.dimension_semantics<arbitrary>], iteration_bounds = array<i64: 1>, scalar_prefetch = 0 : i64, scratch_operands = 0 : i64, tpu.core_type = #tpu.core_type<tc>, window_params = [{transform_indices = @transform_0, window_bounds = array<i64: 16, 128>}, {transform_indices = @transform_1, window_bounds = array<i64: 16, 128>}, {pipeline_mode = #tpu.pipeline_mode<synchronous>, transform_indices = @transform_2, window_bounds = array<i64: 8, 128>}]} {
    %c0_i32 = arith.constant 0 : i32
    %0 = arith.cmpi eq, %arg0, %c0_i32 : i32
    %1 = arith.extui %0 : i1 to i32
    %c0_i32_0 = arith.constant 0 : i32
    %2 = arith.cmpi ne, %1, %c0_i32_0 : i32
    scf.if %2 {
      %cst_15 = arith.constant 0.000000e+00 : f32
      %37 = vector.broadcast %cst_15 : f32 to vector<8x128xf32>
      %c0_16 = arith.constant 0 : index
      %c0_17 = arith.constant 0 : index
      %38 = vector.load %arg3[%c0_16, %c0_17] : memref<8x128xf32, #tpu.memory_space<vmem>>, vector<8x128xf32>
      tpu.vector_store %arg3[%c0_16, %c0_17], %37 {strides = array<i32>} : memref<8x128xf32, #tpu.memory_space<vmem>>, vector<8x128xf32>,
    } else {
    }
    %c0 = arith.constant 0 : index
    %c0_1 = arith.constant 0 : index
    %3 = vector.load %arg1[%c0, %c0_1] : memref<16x128xf32, #tpu.memory_space<vmem>>, vector<16x128xf32>
    %c0_2 = arith.constant 0 : index
    %c0_3 = arith.constant 0 : index
    %4 = vector.load %arg2[%c0_2, %c0_3] : memref<16x128xf32, #tpu.memory_space<vmem>>, vector<16x128xf32>
    %cst = arith.constant 5.000000e-01 : f32
    %5 = vector.broadcast %cst : f32 to vector<16x128xf32>
    %6 = arith.cmpf oge, %4, %5 : vector<16x128xf32>
    %cst_4 = arith.constant 0.000000e+00 : f32
    %7 = vector.broadcast %cst_4 : f32 to vector<16x128xf32>
    %8 = arith.subf %7, %3 : vector<16x128xf32>
    %9 = arith.select %6, %3, %8 : vector<16x128xi1>, vector<16x128xf32>
    %10 = math.absf %3 : vector<16x128xf32>
    %cst_5 = arith.constant 0.000000e+00 : f32
    %11 = vector.broadcast %cst_5 : f32 to vector<16x128xf32>
    %12 = arith.subf %11, %10 : vector<16x128xf32>
    %13 = math.exp %12 : vector<16x128xf32>
    %cst_6 = arith.constant 1.000000e+00 : f32
    %14 = vector.broadcast %cst_6 : f32 to vector<16x128xf32>
    %15 = arith.addf %14, %13 : vector<16x128xf32>
    %16 = tpu.reciprocal %15 {approx = true} : vector<16x128xf32> -> vector<16x128xf32>
    %17 = arith.mulf %15, %16 : vector<16x128xf32>
    %cst_7 = arith.constant 2.000000e+00 : f32
    %18 = vector.broadcast %cst_7 : f32 to vector<16x128xf32>
    %19 = arith.subf %18, %17 : vector<16x128xf32>
    %20 = arith.mulf %16, %19 : vector<16x128xf32>
    %cst_8 = arith.constant 0.000000e+00 : f32
    %21 = vector.broadcast %cst_8 : f32 to vector<16x128xf32>
    %22 = arith.cmpf oge, %9, %21 : vector<16x128xf32>
    %23 = arith.mulf %13, %20 : vector<16x128xf32>
    %24 = arith.select %22, %23, %20 : vector<16x128xi1>, vector<16x128xf32>
    %25 = arith.select %6, %8, %3 : vector<16x128xi1>, vector<16x128xf32>
    %cst_9 = arith.constant 0.000000e+00 : f32
    %26 = vector.broadcast %cst_9 : f32 to vector<16x128xf32>
    %27 = arith.maximumf %25, %26 : vector<16x128xf32>
    %28 = math.log1p %13 : vector<16x128xf32>
    %29 = arith.addf %27, %28 : vector<16x128xf32>
    %30 = arith.mulf %24, %24 : vector<16x128xf32>
    %31 = arith.mulf %30, %29 : vector<16x128xf32>
    %c0_10 = arith.constant 0 : index
    %c0_11 = arith.constant 0 : index
    %32 = vector.load %arg3[%c0_10, %c0_11] : memref<8x128xf32, #tpu.memory_space<vmem>>, vector<8x128xf32>
    %33 = vector.shape_cast %31 : vector<16x128xf32> to vector<2x8x128xf32>
    %cst_12 = arith.constant dense<0.000000e+00> : vector<8x128xf32>
    %34 = vector.multi_reduction <add>, %33, %cst_12 [0] : vector<2x8x128xf32> to vector<8x128xf32>
    %35 = arith.addf %32, %34 : vector<8x128xf32>
    %c0_13 = arith.constant 0 : index
    %c0_14 = arith.constant 0 : index
    %36 = vector.load %arg3[%c0_13, %c0_14] : memref<8x128xf32, #tpu.memory_space<vmem>>, vector<8x128xf32>
    tpu.vector_store %arg3[%c0_13, %c0_14], %35 {strides = array<i32>} : memref<8x128xf32, #tpu.memory_space<vmem>>, vector<8x128xf32>,
    return
  }
  func.func @transform_0(%arg0: i32) -> (i32, i32) {
    %c0_i32 = arith.constant 0 : i32
    %c0_i32_0 = arith.constant 0 : i32
    return %arg0, %c0_i32 : i32, i32
  }
  func.func @transform_1(%arg0: i32) -> (i32, i32) {
    %c0_i32 = arith.constant 0 : i32
    %c0_i32_0 = arith.constant 0 : i32
    return %arg0, %c0_i32 : i32, i32
  }
  func.func @transform_2(%arg0: i32) -> (i32, i32) {
    %c0_i32 = arith.constant 0 : i32
    %c0_i32_0 = arith.constant 0 : i32
    %c0_i32_1 = arith.constant 0 : i32
    return %c0_i32, %c0_i32_0 : i32, i32
  }
}

</mosaic_0001>

<bundles_post_ra>
// kernel: _lambda_.1
= control target key start
LH: loop header
LB: loop body
LE: loop exit
PB: predicated region body
PF: predicated region fallthrough
CT: control target
= control target key end

     0   :  { %s145_s0 = inlined_call_operand.vmem [shape: f32[16,128], index: 0, kind: input, shape index: {}]   ;;  %s146_s1 = inlined_call_operand.vmem [shape: f32[16,128], index: 1, kind: input, shape index: {}]   ;;  %s147_s2 = inlined_call_operand.vmem [shape: f32[8,128], index: 2, kind: output, shape index: {}]  }
   0x1   :  { %v16_v0 = vld [vmem:[%s145_s0] sm:$0xff]  ;;  %v17_v1 = vld [vmem:[%s145_s0 + $0x8] sm:$0xff] }
   0x2   :  { %v26_v2 = vand.u32 2147483647, %v16_v0  ;;  %v27_v3 = vand.u32 2147483647, %v17_v1  ;;  %v18_v14 = vld [vmem:[%s146_s1] sm:$0xff]  ;;  %v19_v15 = vld [vmem:[%s146_s1 + $0x8] sm:$0xff] }
   0x3   :  { %v22_v16 = vsub.f32 0.0, %v16_v0  ;;  %vm20_vm0 = vcmp.ge.f32.partialorder %v18_v14, 0.5  ;;  %v23_v18 = vsub.f32 0.0, %v17_v1  ;;  %vm21_vm1 = vcmp.ge.f32.partialorder %v19_v15, 0.5 }
   0x4   :  { %v28_v4 = vsub.f32 0.0, %v26_v2  ;;  %v29_v5 = vsub.f32 0.0, %v27_v3 }
   0x5   :  { %v50_v25 = vsel %vm20_vm0, %v22_v16, %v16_v0  ;;  %v51_v29 = vsel %vm21_vm1, %v23_v18, %v17_v1  ;;  %v24_v33 = vsel %vm20_vm0, %v16_v0, %v22_v16  ;;  %v25_v37 = vsel %vm21_vm1, %v17_v1, %v23_v18 }
   0x6   :  { %v30_v6 = vmul.f32 1.442695, %v28_v4  ;;  %v32_v7 = vmul.f32 1.442695, %v29_v5  ;;  %v52_v39 = vmax.f32 %v50_v25, 0.0  ;;  %v53_v42 = vmax.f32 %v51_v29, 0.0 }
   0x7   :  { %vm44_vm4 = vcmp.ge.f32.partialorder %v24_v33, 0.0  ;;  %vm45_vm5 = vcmp.ge.f32.partialorder %v25_v37, 0.0 }
   0x8   :  { %87 = vpow2.f32 %v30_v6 }
   0x9   :  { %89 = vpow2.f32 %v32_v7 }
  0x15   :  { %v88_v8 = vpop.eup %87 }
  0x16   :  { %v90_v9 = vpop.eup %89  ;;  %v34_v10 = vadd.f32 1.0, %v88_v8  ;;  %v57_v12 = vmul.f32 -0.5, %v88_v8  ;;  %v60_v19 = vand.u32 2147483647, %v88_v8 }
  0x17   :  { %v35_v11 = vadd.f32 1.0, %v90_v9  ;;  %v66_v13 = vmul.f32 -0.5, %v90_v9  ;;  %v69_v21 = vand.u32 2147483647, %v90_v9 }
  0x18   :  { %91 = vrcp.f32 %v34_v10  ;;  %v58_v17 = vadd.f32 1.0, %v57_v12  ;;  %vm128_vm2 = vcmp.lt.f32.partialorder %v60_v19, 0.0004427343 }
  0x19   :  { %93 = vrcp.f32 %v35_v11  ;;  %v67_v20 = vadd.f32 1.0, %v66_v13  ;;  %vm133_vm3 = vcmp.lt.f32.partialorder %v69_v21, 0.0004427343 }
  0x1a   :  { %95 = vlog2.f32 %v34_v10  ;;  %v59_v26 = vmul.f32 %v88_v8, %v58_v17 }
  0x1b   :  { %97 = vlog2.f32 %v35_v11  ;;  %v68_v31 = vmul.f32 %v90_v9, %v67_v20 }
  0x25   :  { %v92_v22 = vpop.eup %91 }
  0x26   :  { %v94_v23 = vpop.eup %93  ;;  %v38_v24 = vmul.f32 %v92_v22, %v34_v10 }
  0x27   :  { %v96_v27 = vpop.eup %95  ;;  %v39_v28 = vmul.f32 %v94_v23, %v35_v11 }
  0x28   :  { %v98_v32 = vpop.eup %97  ;;  %v40_v34 = vsub.f32 2.0, %v38_v24  ;;  %v56_v35 = vmul.f32 0.6931472, %v96_v27 }
  0x29   :  { %v41_v38 = vsub.f32 2.0, %v39_v28  ;;  %v65_v40 = vmul.f32 0.6931472, %v98_v32 }
  0x2a   :  { %v42_v41 = vmul.f32 %v92_v22, %v40_v34  ;;  %v62_v43 = vsel %vm128_vm2, %v59_v26, %v56_v35 }
  0x2b   :  { %v43_v44 = vmul.f32 %v94_v23, %v41_v38  ;;  %v71_v45 = vsel %vm133_vm3, %v68_v31, %v65_v40  ;;  %v72_v48 = vadd.f32 %v62_v43, %v52_v39 }
  0x2c   :  { %v46_v46 = vmul.f32 %v88_v8, %v42_v41  ;;  %v73_v50 = vadd.f32 %v71_v45, %v53_v42 }
  0x2d   :  { %v47_v47 = vmul.f32 %v90_v9, %v43_v44 }
  0x2e   :  { %v48_v49 = vsel %vm44_vm4, %v46_v46, %v42_v41 }
  0x2f   :  { %v49_v51 = vsel %vm45_vm5, %v47_v47, %v43_v44  ;;  %v74_v52 = vmul.f32 %v48_v49, %v48_v49 }
  0x30   :  { %v75_v53 = vmul.f32 %v49_v51, %v49_v51 }
  0x31   :  { %v76_v54 = vmul.f32 %v74_v52, %v72_v48 }
  0x32   :  { %v77_v55 = vmul.f32 %v75_v53, %v73_v50 }
  0x34   :  { %v79_v56 = vadd.f32 %v77_v55, %v76_v54 }
  0x36   :  { %81 = vst [vmem:[%s147_s2] sm:$0xff] %v79_v56 }

</bundles_post_ra>
